<compile_context>
chip_gen: v5e
topology: v5e:2x2
jax: 0.10.0
libtpu: 0.0.40
codegen_flags: <defaults>
</compile_context>

<pallas_src>
import functools

import jax
import jax.numpy as jnp
from jax import lax
from jax.experimental import pallas as pl
from jax.experimental.pallas import tpu as pltpu


def _round_up(x, m):
    return (x + m - 1) // m * m


# ---------------------------------------------------------------------------
# Kernel 1: full-softmax NLL (ns == 0)
#   fused u-gather (+cbow mean), z = u @ v.T streamed over V tiles,
#   online softmax, loss = mean(lse - z[target])
# ---------------------------------------------------------------------------
def _softmax_nll_kernel(vocab_size,          # static: true (unpadded) V
                        ctx_ref,             # SMEM (B, C) i32  (scalar prefetch)
                        tgt_ref,             # VMEM (B, 1) i32
                        u_w_ref,             # VMEM (V, Dp) f32  (resident)
                        vt_ref,              # VMEM (Dp, TILE_V) bf16 (streamed)
                        loss_ref,            # SMEM (1, 1) f32 output
                        u_emb_ref,           # VMEM (B, Dp) f32 scratch
                        m_ref, l_ref, zt_ref):  # VMEM (B, 1) f32 scratch
    k = pl.program_id(0)
    nk = pl.num_programs(0)
    B, _ = u_emb_ref.shape
    tile_v = vt_ref.shape[1]
    C = ctx_ref.shape[1]

    @pl.when(k == 0)
    def _init():
        m_ref[...] = jnp.full((B, 1), -1e30, jnp.float32)
        l_ref[...] = jnp.zeros((B, 1), jnp.float32)
        zt_ref[...] = jnp.zeros((B, 1), jnp.float32)

        # Fused embedding gather (skip-gram: C == 1; cbow: mean over C rows).
        def gather(b, carry):
            row = u_w_ref[pl.ds(ctx_ref[b, 0], 1), :]
            for c in range(1, C):
                row = row + u_w_ref[pl.ds(ctx_ref[b, c], 1), :]
            u_emb_ref[pl.ds(b, 1), :] = row * (1.0 / C)
            return carry

        lax.fori_loop(0, B, gather, 0)

    # MXU: bf16 x bf16 -> f32, RHS already lane-major (Dp, TILE_V).
    u = u_emb_ref[...].astype(jnp.bfloat16)
    z = jnp.dot(u, vt_ref[...], preferred_element_type=jnp.float32)  # (B, TILE_V)

    col = k * tile_v + lax.broadcasted_iota(jnp.int32, (B, tile_v), 1)
    valid = col < vocab_size
    z_m = jnp.where(valid, z, jnp.float32(-1e30))   # mask padded columns

    # Online softmax accumulators.
    m_prev = m_ref[...]
    m_new = jnp.maximum(m_prev, jnp.max(z_m, axis=1, keepdims=True))
    alpha = jnp.exp(m_prev - m_new)
    p = jnp.exp(z_m - m_new) * valid.astype(jnp.float32)
    l_ref[...] = alpha * l_ref[...] + jnp.sum(p, axis=1, keepdims=True)
    m_ref[...] = m_new

    # z at the target column (no log_softmax materialization).
    onehot = (col == tgt_ref[...]).astype(jnp.float32)
    zt_ref[...] = zt_ref[...] + jnp.sum(onehot * z, axis=1, keepdims=True)

    @pl.when(k == nk - 1)
    def _finalize():
        lse = m_ref[...] + jnp.log(l_ref[...])
        loss_ref[0, 0] = jnp.sum(lse - zt_ref[...]) / jnp.float32(B)


def full_softmax_nll_loss(u_weight, v_weight, ctx_idx, targets, *, tile_v=512):
    V, D = u_weight.shape
    B, C = ctx_idx.shape
    Dp = _round_up(D, 128)
    tile_v = min(tile_v, _round_up(V, 128))
    assert tile_v % 128 == 0
    Vp = _round_up(V, tile_v)
    nk = Vp // tile_v

    # One-time layout plumbing: pad D to 128 lanes, transpose v to lane-major
    # (Dp, Vp) and store it bf16 so each streamed tile is half the HBM bytes.
    u_pad = jnp.zeros((V, Dp), jnp.float32).at[:, :D].set(u_weight)
    vt = jnp.zeros((Dp, Vp), jnp.bfloat16).at[:D, :V].set(
        v_weight.T.astype(jnp.bfloat16))

    ctx = ctx_idx.astype(jnp.int32)
    tgt = targets.astype(jnp.int32).reshape(B, 1)

    kernel = functools.partial(_softmax_nll_kernel, V)

    grid_spec = pltpu.PrefetchScalarGridSpec(
        num_scalar_prefetch=1,                      # ctx indices -> SMEM
        grid=(nk,),
        in_specs=[
            pl.BlockSpec((B, 1), lambda k, ctx_r: (0, 0)),       # targets
            pl.BlockSpec((V, Dp), lambda k, ctx_r: (0, 0)),      # u table (resident)
            pl.BlockSpec((Dp, tile_v), lambda k, ctx_r: (0, k)),  # v tile (streamed)
        ],
        out_specs=pl.BlockSpec((1, 1), lambda k, ctx_r: (0, 0),
                               memory_space=pltpu.MemorySpace.SMEM),
        scratch_shapes=[
            pltpu.VMEM((B, Dp), jnp.float32),   # gathered u embeddings
            pltpu.VMEM((B, 1), jnp.float32),    # running max
            pltpu.VMEM((B, 1), jnp.float32),    # running sum
            pltpu.VMEM((B, 1), jnp.float32),    # running z[target]
        ],
    )

    cost = pl.CostEstimate(
        flops=2 * B * Vp * Dp,
        transcendentals=B * Vp,
        bytes_accessed=Vp * Dp * 2 + V * Dp * 4 + B * C * 4 + B * 4 + 4,
    )

    out = pl.pallas_call(
        kernel,
        grid_spec=grid_spec,
        out_shape=jax.ShapeDtypeStruct((1, 1), jnp.float32),
        compiler_params=pltpu.CompilerParams(
            # V axis is a reduction -> "arbitrary". For large B, add a leading
            # batch-tile "parallel" axis so both v7x TensorCores are used.
            dimension_semantics=("arbitrary",),
            vmem_limit_bytes=32 * 1024 * 1024,
        ),
        cost_estimate=cost,
    )(ctx, tgt, u_pad, vt)
    return out[0, 0]


# ---------------------------------------------------------------------------
# Kernel 2: negative sampling (ns != 0)
#   fused u-gather (+cbow mean) and v-gather; positive score is column 0 of the
#   same (K+1)-row multiply-reduce as the negatives; lane-dense Dp = 128.
# ---------------------------------------------------------------------------
def _neg_sampling_kernel(ctx_ref,   # SMEM (B, C) i32
                         pv_ref,    # SMEM (B, K+1) i32 (col 0 = positive word)
                         u_w_ref,   # VMEM (V, Dp) f32
                         v_w_ref,   # VMEM (V, Dp) f32
                         loss_ref):  # SMEM (1, 1) f32 output
    B, C = ctx_ref.shape
    kp1 = pv_ref.shape[1]

    row_id = lax.broadcasted_iota(jnp.int32, (kp1, 1), 0)
    sign = jnp.where(row_id == 0, 1.0, -1.0).astype(jnp.float32)  # +1 pos, -1 neg

    def body(b, acc):
        # u embedding (mean over context for cbow; C == 1 for skip-gram).
        u = u_w_ref[pl.ds(ctx_ref[b, 0], 1), :]
        for c in range(1, C):
            u = u + u_w_ref[pl.ds(ctx_ref[b, c], 1), :]
        u = u * (1.0 / C)                                          # (1, Dp)

        # Gather positive + K negative v rows, one multiply-reduce for all.
        vrows = jnp.concatenate(
            [v_w_ref[pl.ds(pv_ref[b, j], 1), :] for j in range(kp1)], axis=0)
        s = jnp.sum(vrows * u, axis=1, keepdims=True)              # (K+1, 1)

        x = sign * s
        # stable log(sigmoid(x)) = min(x, 0) - log1p(exp(-|x|))
        logsig = jnp.minimum(x, 0.0) - jnp.log1p(jnp.exp(-jnp.abs(x)))
        return acc + jnp.sum(logsig)

    total = lax.fori_loop(0, B, body, jnp.float32(0.0))
    loss_ref[0, 0] = -total


def negative_sampling_loss(u_weight, v_weight, ctx_idx, pos_idx, neg_idx):
    V, D = u_weight.shape
    B, _ = ctx_idx.shape
    Dp = _round_up(D, 128)

    u_pad = jnp.zeros((V, Dp), jnp.float32).at[:, :D].set(u_weight)
    v_pad = jnp.zeros((V, Dp), jnp.float32).at[:, :D].set(v_weight)

    ctx = ctx_idx.astype(jnp.int32)
    pv = jnp.concatenate(
        [pos_idx.astype(jnp.int32).reshape(B, 1), neg_idx.astype(jnp.int32)],
        axis=1)

    smem = pl.BlockSpec(memory_space=pltpu.MemorySpace.SMEM)
    vmem = pl.BlockSpec(memory_space=pltpu.MemorySpace.VMEM)
    out = pl.pallas_call(
        _neg_sampling_kernel,
        out_shape=jax.ShapeDtypeStruct((1, 1), jnp.float32),
        in_specs=[smem, smem, vmem, vmem],
        out_specs=smem,
        compiler_params=pltpu.CompilerParams(
            vmem_limit_bytes=32 * 1024 * 1024),
    )(ctx, pv, u_pad, v_pad)
    return out[0, 0]


# ---------------------------------------------------------------------------
# word2vec forward wrapper (matches the PyTorch module's forward semantics)
# ---------------------------------------------------------------------------
@functools.partial(jax.jit, static_argnames=("model_type", "ns"))
def word2vec_forward(u_weight, v_weight, batch, *, model_type, ns):
    b0 = batch[0]
    # skip-gram: (B,) center words -> (B, 1); cbow: (B, 2*window) contexts.
    ctx = b0 if b0.ndim == 2 else b0.reshape(b0.shape[0], 1)
    if ns == 0:
        # tile_v=128 keeps >1 grid steps at the demo vocab so the online-softmax
        # accumulators are exercised; raise for realistic V.
        return full_softmax_nll_loss(u_weight, v_weight, ctx, batch[1],
                                     tile_v=128)
    return negative_sampling_loss(u_weight, v_weight, ctx, batch[1], batch[2])


if __name__ == "__main__":
    vocab_size = 255            # module adds +1 -> V = 256
    V = vocab_size + 1
    D = 32                      # embedding_dim
    B = 8                       # batch size
    K = 8                       # negative_samples
    window = 2                  # cbow context width -> 2*window context words

    key = jax.random.PRNGKey(0)
    k_u, k_v, k_c, k_t, k_ctx, k_neg = jax.random.split(key, 6)

    # u per module init ~ U(-0.5/D, 0.5/D). Module inits v to zeros, which makes
    # every loss trivially constant; use small random v so the numerical check
    # against the pure-JAX reference is meaningful (forward is weight-agnostic).
    initrange = 0.5 / D
    u_weight = jax.random.uniform(k_u, (V, D), jnp.float32,
                                  -initrange, initrange)
    v_weight = 0.1 * jax.random.normal(k_v, (V, D), dtype=jnp.float32)

    centers = jax.random.randint(k_c, (B,), 1, V, dtype=jnp.int32)
    targets = jax.random.randint(k_t, (B,), 0, V, dtype=jnp.int32)
    contexts = jax.random.randint(k_ctx, (B, 2 * window), 1, V, dtype=jnp.int32)
    negs = jax.random.randint(k_neg, (B, K), 1, V, dtype=jnp.int32)

    def ref_forward(batch, model_type, ns):
        if model_type == "skip-gram":
            u_emb = u_weight[batch[0]]
        else:
            u_emb = jnp.mean(u_weight[batch[0]], axis=1)
        if ns == 0:
            z = u_emb @ v_weight.T
            logsm = jax.nn.log_softmax(z, axis=1)
            return -jnp.mean(logsm[jnp.arange(u_emb.shape[0]), batch[1]])
        v_emb = v_weight[batch[1]]
        v_neg = v_weight[batch[2]]
        score = jnp.sum(u_emb * v_emb, axis=1)
        neg_score = -jnp.sum(u_emb[:, None, :] * v_neg, axis=2)
        return -(jnp.sum(jax.nn.log_sigmoid(score))
                 + jnp.sum(jax.nn.log_sigmoid(neg_score)))

    cases = [
        ("skip-gram", 0, (centers, targets)),
        ("skip-gram", 1, (centers, targets, negs)),
        ("cbow", 0, (contexts, targets)),
        ("cbow", 1, (contexts, targets, negs)),
    ]
    for mt, ns, batch in cases:
        got = word2vec_forward(u_weight, v_weight, batch, model_type=mt, ns=ns)
        ref = ref_forward(batch, mt, ns)
        got, ref = jax.block_until_ready((got, ref))
        assert bool(jnp.isfinite(got)), (mt, ns)
        assert abs(float(got) - float(ref)) < 5e-3, (mt, ns, float(got), float(ref))

    print("KERNEL_OK")
</pallas_src>

<mosaic_0001>
module attributes {stable_mosaic.version = 11 : i64} {
  func.func @_softmax_nll_kernel(%arg0: i32, %arg1: memref<8x1xi32, #tpu.memory_space<smem>>, %arg2: memref<8x1xi32, #tpu.memory_space<vmem>>, %arg3: memref<256x128xf32, #tpu.memory_space<vmem>>, %arg4: memref<128x128xbf16, #tpu.memory_space<vmem>>, %arg5: memref<1x1xf32, #tpu.memory_space<smem>>, %arg6: memref<8x128xf32, #tpu.memory_space<vmem>>, %arg7: memref<8x1xf32, #tpu.memory_space<vmem>>, %arg8: memref<8x1xf32, #tpu.memory_space<vmem>>, %arg9: memref<8x1xf32, #tpu.memory_space<vmem>>) attributes {dimension_semantics = [#tpu.dimension_semantics<arbitrary>], iteration_bounds = array<i64: 2>, scalar_prefetch = 1 : i64, scratch_operands = 4 : i64, tpu.core_type = #tpu.core_type<tc>, window_params = [{pipeline_mode = #tpu.pipeline_mode<synchronous>, transform_indices = @transform_0, window_bounds = array<i64: 8, 1>}, {pipeline_mode = #tpu.pipeline_mode<synchronous>, transform_indices = @transform_1, window_bounds = array<i64: 256, 128>}, {transform_indices = @transform_2, window_bounds = array<i64: 128, 128>}, {transform_indices = @transform_3, window_bounds = array<i64: 1, 1>}]} {
    %c0_i32 = arith.constant 0 : i32
    %0 = arith.cmpi eq, %arg0, %c0_i32 : i32
    %1 = arith.extui %0 : i1 to i32
    %c0_i32_0 = arith.constant 0 : i32
    %2 = arith.cmpi ne, %1, %c0_i32_0 : i32
    scf.if %2 {
      %cst_23 = arith.constant -1.000000e+30 : f32
      %48 = vector.broadcast %cst_23 : f32 to vector<8x1xf32>
      %c0_24 = arith.constant 0 : index
      %c0_25 = arith.constant 0 : index
      %49 = vector.load %arg7[%c0_24, %c0_25] : memref<8x1xf32, #tpu.memory_space<vmem>>, vector<8x1xf32>
      tpu.vector_store %arg7[%c0_24, %c0_25], %48 {strides = array<i32>} : memref<8x1xf32, #tpu.memory_space<vmem>>, vector<8x1xf32>,
      %cst_26 = arith.constant 0.000000e+00 : f32
      %50 = vector.broadcast %cst_26 : f32 to vector<8x1xf32>
      %c0_27 = arith.constant 0 : index
      %c0_28 = arith.constant 0 : index
      %51 = vector.load %arg8[%c0_27, %c0_28] : memref<8x1xf32, #tpu.memory_space<vmem>>, vector<8x1xf32>
      tpu.vector_store %arg8[%c0_27, %c0_28], %50 {strides = array<i32>} : memref<8x1xf32, #tpu.memory_space<vmem>>, vector<8x1xf32>,
      %cst_29 = arith.constant 0.000000e+00 : f32
      %52 = vector.broadcast %cst_29 : f32 to vector<8x1xf32>
      %c0_30 = arith.constant 0 : index
      %c0_31 = arith.constant 0 : index
      %53 = vector.load %arg9[%c0_30, %c0_31] : memref<8x1xf32, #tpu.memory_space<vmem>>, vector<8x1xf32>
      tpu.vector_store %arg9[%c0_30, %c0_31], %52 {strides = array<i32>} : memref<8x1xf32, #tpu.memory_space<vmem>>, vector<8x1xf32>,
      %c0_i32_32 = arith.constant 0 : i32
      %c8_i32 = arith.constant 8 : i32
      %54 = arith.addi %c0_i32_32, %c8_i32 : i32
      %c1_i32_33 = arith.constant 1 : i32
      scf.for %arg10 = %c0_i32_32 to %54 step %c1_i32_33  : i32 {
        %55 = arith.index_cast %arg10 : i32 to index
        %c0_35 = arith.constant 0 : index
        %56 = memref.load %arg1[%55, %c0_35] : memref<8x1xi32, #tpu.memory_space<smem>>
        %57 = arith.index_cast %56 : i32 to index
        %c0_36 = arith.constant 0 : index
        %58 = vector.load %arg3[%57, %c0_36] : memref<256x128xf32, #tpu.memory_space<vmem>>, vector<1x128xf32>
        %cst_37 = arith.constant 1.000000e+00 : f32
        %59 = vector.broadcast %cst_37 : f32 to vector<1x128xf32>
        %60 = arith.mulf %58, %59 : vector<1x128xf32>
        %61 = arith.index_cast %arg10 : i32 to index
        %c0_38 = arith.constant 0 : index
        %62 = vector.load %arg6[%61, %c0_38] : memref<8x128xf32, #tpu.memory_space<vmem>>, vector<1x128xf32>
        tpu.vector_store %arg6[%61, %c0_38], %60 {strides = array<i32>} : memref<8x128xf32, #tpu.memory_space<vmem>>, vector<1x128xf32>,
      }
      %c8_i32_34 = arith.constant 8 : i32
    } else {
    }
    %c0 = arith.constant 0 : index
    %c0_1 = arith.constant 0 : index
    %3 = vector.load %arg6[%c0, %c0_1] : memref<8x128xf32, #tpu.memory_space<vmem>>, vector<8x128xf32>
    %4 = arith.truncf %3 : vector<8x128xf32> to vector<8x128xbf16>
    %c0_2 = arith.constant 0 : index
    %c0_3 = arith.constant 0 : index
    %5 = vector.load %arg4[%c0_2, %c0_3] : memref<128x128xbf16, #tpu.memory_space<vmem>>, vector<128x128xbf16>
    %cst = arith.constant dense<0.000000e+00> : vector<8x128xf32>
    %6 = tpu.matmul %4, %5, %cst {dimension_numbers = #tpu.dot_dimension_numbers<[1], [0], [0], [1], [0, 0, 1, 1], [], []>} : vector<8x128xbf16>, vector<128x128xbf16>, vector<8x128xf32> -> vector<8x128xf32>
    %c128_i32 = arith.constant 128 : i32
    %7 = arith.muli %arg0, %c128_i32 : i32
    %8 = tpu.iota {dimensions = array<i32: 1>} : vector<8x128xi32>
    %9 = vector.broadcast %7 : i32 to vector<8x128xi32>
    %10 = arith.addi %9, %8 : vector<8x128xi32>
    %c256_i32 = arith.constant 256 : i32
    %11 = vector.broadcast %c256_i32 : i32 to vector<8x128xi32>
    %12 = arith.cmpi slt, %10, %11 : vector<8x128xi32>
    %cst_4 = arith.constant -1.000000e+30 : f32
    %13 = vector.broadcast %cst_4 : f32 to vector<8x128xf32>
    %14 = arith.select %12, %6, %13 : vector<8x128xi1>, vector<8x128xf32>
    %c0_5 = arith.constant 0 : index
    %c0_6 = arith.constant 0 : index
    %15 = vector.load %arg7[%c0_5, %c0_6] : memref<8x1xf32, #tpu.memory_space<vmem>>, vector<8x1xf32>
    %cst_7 = arith.constant dense<0xFF800000> : vector<8xf32>
    %16 = vector.multi_reduction <maximumf>, %14, %cst_7 [1] : vector<8x128xf32> to vector<8xf32>
    %17 = vector.shape_cast %16 : vector<8xf32> to vector<8x1xf32>
    %18 = arith.maximumf %15, %17 : vector<8x1xf32>
    %19 = arith.subf %15, %18 : vector<8x1xf32>
    %20 = math.exp %19 : vector<8x1xf32>
    %21 = vector.broadcast %18 : vector<8x1xf32> to vector<8x128xf32>
    %22 = arith.subf %14, %21 : vector<8x128xf32>
    %23 = math.exp %22 : vector<8x128xf32>
    %24 = arith.extui %12 : vector<8x128xi1> to vector<8x128xi32>
    %25 = arith.sitofp %24 : vector<8x128xi32> to vector<8x128xf32>
    %26 = arith.mulf %23, %25 : vector<8x128xf32>
    %c0_8 = arith.constant 0 : index
    %c0_9 = arith.constant 0 : index
    %27 = vector.load %arg8[%c0_8, %c0_9] : memref<8x1xf32, #tpu.memory_space<vmem>>, vector<8x1xf32>
    %28 = arith.mulf %20, %27 : vector<8x1xf32>
    %cst_10 = arith.constant dense<0.000000e+00> : vector<8xf32>
    %29 = vector.multi_reduction <add>, %26, %cst_10 [1] : vector<8x128xf32> to vector<8xf32>
    %30 = vector.shape_cast %29 : vector<8xf32> to vector<8x1xf32>
    %31 = arith.addf %28, %30 : vector<8x1xf32>
    %c0_11 = arith.constant 0 : index
    %c0_12 = arith.constant 0 : index
    %32 = vector.load %arg8[%c0_11, %c0_12] : memref<8x1xf32, #tpu.memory_space<vmem>>, vector<8x1xf32>
    tpu.vector_store %arg8[%c0_11, %c0_12], %31 {strides = array<i32>} : memref<8x1xf32, #tpu.memory_space<vmem>>, vector<8x1xf32>,
    %c0_13 = arith.constant 0 : index
    %c0_14 = arith.constant 0 : index
    %33 = vector.load %arg7[%c0_13, %c0_14] : memref<8x1xf32, #tpu.memory_space<vmem>>, vector<8x1xf32>
    tpu.vector_store %arg7[%c0_13, %c0_14], %18 {strides = array<i32>} : memref<8x1xf32, #tpu.memory_space<vmem>>, vector<8x1xf32>,
    %c0_15 = arith.constant 0 : index
    %c0_16 = arith.constant 0 : index
    %34 = vector.load %arg2[%c0_15, %c0_16] : memref<8x1xi32, #tpu.memory_space<vmem>>, vector<8x1xi32>
    %35 = vector.broadcast %34 : vector<8x1xi32> to vector<8x128xi32>
    %36 = arith.cmpi eq, %10, %35 : vector<8x128xi32>
    %37 = arith.extui %36 : vector<8x128xi1> to vector<8x128xi32>
    %38 = arith.sitofp %37 : vector<8x128xi32> to vector<8x128xf32>
    %c0_17 = arith.constant 0 : index
    %c0_18 = arith.constant 0 : index
    %39 = vector.load %arg9[%c0_17, %c0_18] : memref<8x1xf32, #tpu.memory_space<vmem>>, vector<8x1xf32>
    %40 = arith.mulf %38, %6 : vector<8x128xf32>
    %cst_19 = arith.constant dense<0.000000e+00> : vector<8xf32>
    %41 = vector.multi_reduction <add>, %40, %cst_19 [1] : vector<8x128xf32> to vector<8xf32>
    %42 = vector.shape_cast %41 : vector<8xf32> to vector<8x1xf32>
    %43 = arith.addf %39, %42 : vector<8x1xf32>
    %c0_20 = arith.constant 0 : index
    %c0_21 = arith.constant 0 : index
    %44 = vector.load %arg9[%c0_20, %c0_21] : memref<8x1xf32, #tpu.memory_space<vmem>>, vector<8x1xf32>
    tpu.vector_store %arg9[%c0_20, %c0_21], %43 {strides = array<i32>} : memref<8x1xf32, #tpu.memory_space<vmem>>, vector<8x1xf32>,
    %c1_i32 = arith.constant 1 : i32
    %45 = arith.cmpi eq, %arg0, %c1_i32 : i32
    %46 = arith.extui %45 : i1 to i32
    %c0_i32_22 = arith.constant 0 : i32
    %47 = arith.cmpi ne, %46, %c0_i32_22 : i32
    scf.if %47 {
      %c0_23 = arith.constant 0 : index
      %c0_24 = arith.constant 0 : index
      %48 = vector.load %arg7[%c0_23, %c0_24] : memref<8x1xf32, #tpu.memory_space<vmem>>, vector<8x1xf32>
      %c0_25 = arith.constant 0 : index
      %c0_26 = arith.constant 0 : index
      %49 = vector.load %arg8[%c0_25, %c0_26] : memref<8x1xf32, #tpu.memory_space<vmem>>, vector<8x1xf32>
      %50 = math.log %49 : vector<8x1xf32>
      %51 = arith.addf %48, %50 : vector<8x1xf32>
      %c0_27 = arith.constant 0 : index
      %c0_28 = arith.constant 0 : index
      %52 = vector.load %arg9[%c0_27, %c0_28] : memref<8x1xf32, #tpu.memory_space<vmem>>, vector<8x1xf32>
      %53 = arith.subf %51, %52 : vector<8x1xf32>
      %54 = vector.shape_cast %53 : vector<8x1xf32> to vector<1x8x1xf32>
      %cst_29 = arith.constant dense<0.000000e+00> : vector<1xf32>
      %55 = vector.multi_reduction <add>, %54, %cst_29 [1, 2] : vector<1x8x1xf32> to vector<1xf32>
      %56 = vector.shape_cast %55 : vector<1xf32> to vector<1x1x1xf32>
      %57 = vector.extract %56[0, 0, 0] : f32 from vector<1x1x1xf32>
      %cst_30 = arith.constant 8.000000e+00 : f32
      %58 = arith.divf %57, %cst_30 : f32
      %c0_31 = arith.constant 0 : index
      %c0_32 = arith.constant 0 : index
      %59 = memref.load %arg5[%c0_31, %c0_32] : memref<1x1xf32, #tpu.memory_space<smem>>
      memref.store %58, %arg5[%c0_31, %c0_32] : memref<1x1xf32, #tpu.memory_space<smem>>
    } else {
    }
    return
  }
  func.func @transform_0(%arg0: i32, %arg1: memref<8x1xi32, #tpu.memory_space<smem>>) -> (i32, i32) {
    %c0_i32 = arith.constant 0 : i32
    %c0_i32_0 = arith.constant 0 : i32
    %c0_i32_1 = arith.constant 0 : i32
    return %c0_i32, %c0_i32_0 : i32, i32
  }
  func.func @transform_1(%arg0: i32, %arg1: memref<8x1xi32, #tpu.memory_space<smem>>) -> (i32, i32) {
    %c0_i32 = arith.constant 0 : i32
    %c0_i32_0 = arith.constant 0 : i32
    %c0_i32_1 = arith.constant 0 : i32
    return %c0_i32, %c0_i32_0 : i32, i32
  }
  func.func @transform_2(%arg0: i32, %arg1: memref<8x1xi32, #tpu.memory_space<smem>>) -> (i32, i32) {
    %c0_i32 = arith.constant 0 : i32
    %c0_i32_0 = arith.constant 0 : i32
    return %c0_i32, %arg0 : i32, i32
  }
  func.func @transform_3(%arg0: i32, %arg1: memref<8x1xi32, #tpu.memory_space<smem>>) -> (i32, i32) {
    %c0_i32 = arith.constant 0 : i32
    %c0_i32_0 = arith.constant 0 : i32
    %c0_i32_1 = arith.constant 0 : i32
    return %c0_i32, %c0_i32_0 : i32, i32
  }
}

</mosaic_0001>

<bundles_post_ra>
// kernel: word2vec_forward.1
= control target key start
LH: loop header
LB: loop body
LE: loop exit
PB: predicated region body
PF: predicated region fallthrough
CT: control target
= control target key end

     0   :  { %s686_s18 = smov [#allocation7]   ;;  %s817_s0 = inlined_call_operand.vmem [shape: s32[8,1], index: 0, kind: input, shape index: {}]   ;;  %s818_s1 = inlined_call_operand.vmem [shape: s32[8,1], index: 1, kind: input, shape index: {}]   ;;  %s819_s2 = inlined_call_operand.vmem [shape: f32[256,128], index: 2, kind: input, shape index: {}]   ;;  %s820_s3 = inlined_call_operand.vmem [shape: bf16[128,256], index: 3, kind: input, shape index: {}]   ;;  %s821_s4 = inlined_call_operand.hbm [shape: f32[1,1], index: 4, kind: output, shape index: {}]  }
   0x1   :  { %s10_s17 = sshll.u32 %s817_s0, 4  ;;  %s11_s17 = int_to_ptr.vmem [resolvable:$true] %s10_s17 }
   0x2   :  { %13 = dma.vmem_to_smem %s11_s17, 128, %s686_s18, [#allocation6] }
   0x3   :  { %664 = dma.done.wait [#allocation6], 128 }
   0x4   :  { %665 = vsyncadd [#allocation6], 4294967168 }
   0x5   :  { %16 = sfence }
   0x6   :  { %17 = vsyncpa [#allocation10], 0  ;;  %s721_s19 = smov 0   ;;  %s723_s20 = smov 0  }
   0x7   :  { %s725_s21 = smov 0  }
   0x8 LB: > { %s737_s0 = sadd.s32 4294967295, %s680_s21   ;;  %s740_s22 = sadd.s32 1, %s680_s21   ;;  %s680_s21 = sphi %s725_s21, %s824_s21   ;;  %s676_s20 = sphi %s723_s20, %s823_s20   ;;  %s672_s19 = sphi %s721_s19, %s822_s19  }
   0x9   : > { %s69_s23 = ssub.s32 %s680_s21, %s740_s22  ;;  %s72_s24 = sadd.s32 1, %s676_s20 }
   0xa   : > { %p70_p0 = scmp.eq.s32.totalorder %s69_s23, 0  ;;  %p79_p1 = scmp.ne.s32.totalorder %s676_s20, %s672_s19 }
   0xb   : > { %p80_p2 = scmp.eq.s32.totalorder %s680_s21, 0  ;;  %p508_p4 = scmp.ge.s32.totalorder %s680_s21, 2 }
   0xc   : > { %s749_s25 = scalar_select %p70_p0, %s676_s20, %s72_s24  }
   0xd   : > { %p81_p3 = por %p80_p2, %p79_p1  ;;  %132 = sbr.rel (%p508_p4) target bundleno = 38 (0x26), region = 24 }
  0x12   : > { %135 = sbr.rel (!%p81_p3) target bundleno = 38 (0x26), region = 28  ;;  %s137_s26 = sand.u32 (%p81_p3), 1, %s676_s20  }
  0x13   : > { %s510_s27 = sshll.u32 (%p81_p3), %s680_s21, 2  ;;  %s509_s28 = sshll.u32 (%p81_p3), %s137_s26, 6 }
  0x14   : > { %s757_s5 = scalar_lea.vmem (%p81_p3), %s820_s3, %s510_s27  ;;  %s139_s6 = scalar_lea.vmem (%p81_p3), [#allocation8], %s509_s28 }
  0x15   : > { %v158_v0 = vld [vmem:[%s757_s5] sm:$0xf] (%p81_p3)  ;;  %v160_v1 = vld [vmem:[%s757_s5 + $0x8] sm:$0xf] (%p81_p3)  ;;  %v162_v2 = vld [vmem:[%s757_s5 + $0x10] sm:$0xf] (%p81_p3) }
  0x16   : > { %159 = vst [vmem:[%s139_s6] sm:$0xf] (%p81_p3), %v158_v0  ;;  %v164_v3 = vld [vmem:[%s757_s5 + $0x18] sm:$0xf] (%p81_p3)  ;;  %v166_v4 = vld [vmem:[%s757_s5 + $0x20] sm:$0xf] (%p81_p3) }
  0x17   : > { %161 = vst [vmem:[%s139_s6 + $0x4] sm:$0xf] %v160_v1  ;;  %v168_v5 = vld [vmem:[%s757_s5 + $0x28] sm:$0xf]  ;;  %v170_v6 = vld [vmem:[%s757_s5 + $0x30] sm:$0xf] }
  0x18   : > { %163 = vst [vmem:[%s139_s6 + $0x8] sm:$0xf] %v162_v2  ;;  %v172_v7 = vld [vmem:[%s757_s5 + $0x38] sm:$0xf]  ;;  %v174_v8 = vld [vmem:[%s757_s5 + $0x40] sm:$0xf] }
  0x19   : > { %165 = vst [vmem:[%s139_s6 + $0xc] sm:$0xf] %v164_v3  ;;  %v176_v9 = vld [vmem:[%s757_s5 + $0x48] sm:$0xf]  ;;  %v178_v10 = vld [vmem:[%s757_s5 + $0x50] sm:$0xf] }
  0x1a   : > { %167 = vst [vmem:[%s139_s6 + $0x10] sm:$0xf] %v166_v4  ;;  %v180_v11 = vld [vmem:[%s757_s5 + $0x58] sm:$0xf]  ;;  %v182_v12 = vld [vmem:[%s757_s5 + $0x60] sm:$0xf] }
  0x1b   : > { %169 = vst [vmem:[%s139_s6 + $0x14] sm:$0xf] %v168_v5  ;;  %v184_v13 = vld [vmem:[%s757_s5 + $0x68] sm:$0xf]  ;;  %v186_v14 = vld [vmem:[%s757_s5 + $0x70] sm:$0xf] }
  0x1c   : > { %171 = vst [vmem:[%s139_s6 + $0x18] sm:$0xf] %v170_v6  ;;  %v188_v15 = vld [vmem:[%s757_s5 + $0x78] sm:$0xf] }
  0x1d   : > { %173 = vst [vmem:[%s139_s6 + $0x1c] sm:$0xf] %v172_v7 }
  0x1e   : > { %175 = vst [vmem:[%s139_s6 + $0x20] sm:$0xf] %v174_v8 }
  0x1f   : > { %177 = vst [vmem:[%s139_s6 + $0x24] sm:$0xf] %v176_v9 }
  0x20   : > { %179 = vst [vmem:[%s139_s6 + $0x28] sm:$0xf] %v178_v10 }
  0x21   : > { %181 = vst [vmem:[%s139_s6 + $0x2c] sm:$0xf] %v180_v11 }
  0x22   : > { %183 = vst [vmem:[%s139_s6 + $0x30] sm:$0xf] %v182_v12 }
  0x23   : > { %185 = vst [vmem:[%s139_s6 + $0x34] sm:$0xf] %v184_v13 }
  0x24   : > { %187 = vst [vmem:[%s139_s6 + $0x38] sm:$0xf] %v186_v14 }
  0x25   : > { %189 = vst [vmem:[%s139_s6 + $0x3c] sm:$0xf] %v188_v15 }
  0x26 PF: > { %p511_p5 = scmp.ge.s32.totalorder %s680_s21, 1  ;;  %p244_p6 = scmp.lt.s32.totalorder %s680_s21, 3 }
  0x28   : > { %p245_p7 = pnand %p511_p5, %p244_p6 }
  0x29   : > { %s251_s7 = sand.u32 (!%p245_p7), 1, %s672_s19   ;;  %p513_p8 = scmp.ne.s32.totalorder (!%p245_p7), %s737_s0, 0 }
  0x2a   : > { %248 = sbr.rel (%p245_p7) target bundleno = 799 (0x31f), region = 69  ;;  %s512_s8 = sshll.u32 (!%p245_p7), %s251_s7, 6 }
  0x2b   : > { %s778_s9 = scalar_lea.vmem (!%p245_p7), [#allocation8], %s512_s8 }
  0x2f   : > { %272 = sbr.rel (%p513_p8) target bundleno = 66 (0x42), region = 77  ;;  %s682_s10 = smov (!%p513_p8), 0  }
  0x34   : > { %vm273_vm0 = vcmask 7168   ;;  %v687_v16 = vmov -1e+30   ;;  %v688_v17 = vmov 0.0  }
  0x35   : > { %274 = vst.msk [vmem:[#allocation3] sm:$0xff] %vm273_vm0, %v687_v16 }
  0x36   : > { %275 = vst.msk [vmem:[#allocation4] sm:$0xff] %vm273_vm0, %v688_v17 }
  0x37   : > { %276 = vst.msk [vmem:[#allocation5] sm:$0xff] %vm273_vm0, %v688_v17 }
  0x38 LB: >> { %s514_s11 = sshll.u32 %s684_s10, 7  ;;  %s287_s16 = scalar_lea.vmem [#allocation2], %s684_s10  ;;  %s684_s10 = sphi %s682_s10, %s282_s10  }
  0x39   : >> { %s284_s12 = sld [smem:[#allocation7 + %s514_s11]]  ;;  %s282_s10 = sadd.s32 1, %s684_s10  }
  0x3a   : >> { %p279_p9 = scmp.ge.s32.totalorder %s282_s10, 8  }
  0x3d   : > { %281 = sbr.rel (!%p279_p9) target bundleno = 56 (0x38), region = 123 }
  0x3f   : >> { %s285_s15 = scalar_lea.vmem %s819_s2, %s284_s12 }
  0x40   : >> { %v286_v18 = vld [vmem:[%s285_s15] sm:$0x1] }
  0x41   : >> { %288 = vst [vmem:[%s287_s16] sm:$0x1] %v286_v18 }
  0x42 PF: > { %v562_v19 = vld [vmem:[%s778_s9 + $0x38] sm:$0xff]  ;;  %v561_v20 = vld [vmem:[%s778_s9 + $0x30] sm:$0xff]  ;;  %v689_v21 = vmov 0   ;;  %v401_v22 = vld [vmem:[%s818_s1] sm:$0xff]  ;;  %v369_v31 = vlaneseq  ;;  %s547_s19 = sshll.u32 %s737_s0, 7  ;;  %v690_v36 = vmov 0.0  }
  0x43   : > { %355 = vmatpush.bf16.msra.mxu0 %v562_v19  ;;  %613 = vset.pattern.permute.xlu1 %v689_v21  ;;  %v560_v23 = vld [vmem:[%s778_s9 + $0x28] sm:$0xff]  ;;  %v559_v24 = vld [vmem:[%s778_s9 + $0x20] sm:$0xff]  ;;  %v558_v25 = vld [vmem:[%s778_s9 + $0x18] sm:$0xff]  ;;  %v371_v33 = vstv %s547_s19  ;;  %vm398_vm3 = vcmask 7168   ;;  %p550_p10 = scmp.ne.s32.totalorder %s737_s0, 1 }
  0x44   : > { %612 = vset.pattern.permute.xlu0 %v689_v21  ;;  %403 = vperm.xlu1 %613, %v401_v22   ;;  %v557_v26 = vld [vmem:[%s778_s9 + $0x10] sm:$0xff]  ;;  %v556_v27 = vld [vmem:[%s778_s9 + $0x8] sm:$0xff]  ;;  %v555_v28 = vld [vmem:[%s778_s9] sm:$0xff]  ;;  %v370_v32 = vand.u32 127, %v369_v31 }
  0x45   : > { %v375_v42 = vld [vmem:[#allocation3] sm:$0xff]  ;;  %v408_v43 = vld [vmem:[#allocation5] sm:$0xff]  ;;  %v393_v57 = vld [vmem:[#allocation4] sm:$0xff] }
  0x46   : > { %v372_v34 = vadd.s32 %v371_v33, %v370_v32 }
  0x47   : > { %356 = vmatpush.bf16.msra.mxu0 %v561_v20 }
  0x48   : > { %v289_v29 = vld [vmem:[#allocation2] sm:$0xff]  ;;  %vm373_vm2 = vcmp.lt.s32.totalorder %v372_v34, 256 }
  0x49   : > { %v290_v30 = vpack.c.bf16 %v289_v29, %v289_v29  ;;  %v548_v52 = vsel %vm373_vm2, 1.0, %v690_v36 }
  0x4b   : > { %357 = vmatpush.bf16.msra.mxu0 %v560_v23 }
  0x4f   : > { %358 = vmatpush.bf16.msra.mxu0 %v559_v24 }
  0x53   : > { %359 = vmatpush.bf16.msra.mxu0 %v558_v25 }
  0x57   : > { %360 = vmatpush.bf16.msra.mxu0 %v557_v26 }
  0x5b   : > { %361 = vmatpush.bf16.msra.mxu0 %v556_v27 }
  0x5f   : > { %362 = vmatpush.bf16.msra.mxu0 %v555_v28 }
  0x62   : > { %363 = vmatmul.bf16.vlgmr.msra.gmra.mxu0 %v290_v30 }
  0xb6   : > { %v404_v35 = vpop.permute.xlu1 %403 }
  0xb7   : > { %vm405_vm1 = vcmp.eq.s32.totalorder %v372_v34, %v404_v35 }
  0xb8   : > { %v549_v37 = vsel %vm405_vm1, 1.0, %v690_v36 }
  0xdf   : > { %v364_v38 = vpop.f32.mrf.mxu0 }
  0xe0   : > { %v374_v39 = vsel %vm373_vm2, %v364_v38, -1e+30  ;;  %v409_v40 = vmul.f32 %v549_v37, %v364_v38 }
  0xe1   : > { %376 = vmax.xlane.f32.xlu0 %v374_v39 }
  0xe2   : > { %410 = vadd.xlane.f32.xlu2 %v409_v40 }
  0xe7   : > { %v366_v41 = vpop.f32.mrf.mxu0 }
 0x154   : > { %v377_v44 = vpop.xlane.xlu0 %376 }
 0x155   : > { %v378_v45 = vmax.f32 %v375_v42, %v377_v44  ;;  %v411_v46 = vpop.xlane.xlu2 %410 }
 0x156   : > { %v412_v47 = vadd.f32 %v411_v46, %v408_v43 }
 0x157   : > { %v379_v48 = vsub.f32 %v375_v42, %v378_v45  ;;  %400 = vst.msk [vmem:[#allocation3] sm:$0xff] %vm398_vm3, %v378_v45  ;;  %384 = vperm.xlu0 %612, %v378_v45  }
 0x158   : > { %413 = vst.msk [vmem:[#allocation5] sm:$0xff] %vm398_vm3, %v412_v47 }
 0x159   : > { %v380_v55 = vmul.f32 1.442695, %v379_v48 }
 0x1c9   : > { %v385_v49 = vpop.permute.xlu0 %384 }
 0x1ca   : > { %v387_v50 = vsub.f32 %v374_v39, %v385_v49 }
 0x1cc   : > { %v388_v51 = vmul.f32 1.442695, %v387_v50 }
 0x1ce   : > { %614 = vpow2.f32 %v388_v51 }
 0x1cf   : > { %616 = vpow2.f32 %v380_v55 }
 0x1d4   : > { %v615_v53 = vpop.eup %614 }
 0x1d5   : > { %v392_v54 = vmul.f32 %v615_v53, %v548_v52  ;;  %v617_v56 = vpop.eup %616 }
 0x1d6   : > { %v394_v58 = vmul.f32 %v617_v56, %v393_v57 }
 0x1d7   : > { %395 = vadd.xlane.f32.xlu1 %v392_v54 }
 0x249   : > { %417 = sbr.rel (%p550_p10) target bundleno = 793 (0x319), region = 88 }
 0x24a   : > { %v396_v59 = vpop.xlane.xlu1 %395 }
 0x24b   : > { %v397_v60 = vadd.f32 %v396_v59, %v394_v58 }
 0x24d   : > { %399 = vst.msk [vmem:[#allocation4] sm:$0xff] %vm398_vm3, %v397_v60 }
 0x24e   : > { %v418_v63 = vld [vmem:[#allocation3] sm:$0xff]  ;;  %v423_v1 = vld [vmem:[#allocation5] sm:$0xff]  ;;  %v691_v5 = vmov 8.0  }
 0x254   : > { %v419_v61 = vld [vmem:[#allocation4] sm:$0xff] }
 0x255   : > { %618 = vlog2.f32 %v419_v61 }
 0x256   : > { %620 = vrcp.f32 %v691_v5 }
 0x25b   : > { %v619_v62 = vpop.eup %618 }
 0x25c   : > { %v421_v0 = vmul.f32 0.6931472, %v619_v62  ;;  %v621_v6 = vpop.eup %620 }
 0x25d   : > { %v436_v7 = vmul.f32 8.0, %v621_v6  ;;  %vm440_vm4 = vweird.f32 %v621_v6 }
 0x25e   : > { %v422_v2 = vadd.f32 %v421_v0, %v418_v63 }
 0x25f   : > { %v437_v8 = vsub.f32 1.0, %v436_v7 }
 0x260   : > { %v424_v3 = vsub.f32 %v422_v2, %v423_v1 }
 0x261   : > { %v438_v12 = vmul.f32 %v621_v6, %v437_v8 }
 0x262   : > { %v425_v4 = vsel %vm398_vm3, %v424_v3, 0.0 }
 0x263   : > { %426 = vadd.xlane.f32.xlu0 %v425_v4  ;;  %v439_v15 = vadd.f32 %v621_v6, %v438_v12 }
 0x265   : > { %v441_v18 = vsel %vm440_vm4, %v621_v6, %v439_v15 }
 0x2d6   : > { %v427_v9 = vpop.xlane.xlu0 %426 }
 0x2d7   : > { %v428_v10 = vrot.slane %v427_v9, 4 }
 0x2d9   : > { %v429_v11 = vadd.f32 %v428_v10, %v427_v9 }
 0x2db   : > { %v430_v13 = vrot.slane %v429_v11, 2 }
 0x2dd   : > { %v431_v14 = vadd.f32 %v430_v13, %v429_v11 }
 0x2df   : > { %v432_v16 = vrot.slane %v431_v14, 1 }
 0x2e1   : > { %v433_v17 = vadd.f32 %v432_v16, %v431_v14 }
 0x2e3   : > { %563 = vpush %v433_v17 }
 0x2e4   : > { %565 = vpush %v441_v18 }
 0x314   : > { %s564_s21 = spop %563 }
 0x315   : > { %s566_s23 = spop %565 }
 0x316   : > { %s443_s24 = smul.f32 %s566_s23, %s564_s21 }
 0x318   : > { %445 = sst [smem:[#allocation9]] %s443_s24 }
 0x319 PF: > { %p571_p11 = scmp.eq.s32.totalorder %s737_s0, 1  ;;  %s452_s28 = sshll.u32 %s821_s4, 4  ;;  %s453_s28 = int_to_ptr.hbm [resolvable:$true] %s452_s28 }
 0x31a   : > { %s692_s29 = smov [#allocation9]  }
 0x31b   : > { %568 = dma.smem_to_hbm (%p571_p11), %s692_s29, 16, %s453_s28, [#allocation10]  }
 0x31c   : > { %667 = dma.done.wait (%p571_p11), [#allocation10], 16  }
 0x31d   : > { %669 = vsyncadd (%p571_p11), [#allocation10], 4294967280 }
 0x31e   : > { %461 = sfence }
 0x31f PF: > { %p20_p12 = scmp.ge.s32.totalorder %s740_s22, 4   ;;  %s822_s19 = smov %s676_s20 }
 0x320   : > { %s823_s20 = smov %s749_s25  ;;  %s824_s21 = smov %s740_s22 }
 0x321   :  { %22 = sbr.rel (!%p20_p12) target bundleno = 8 (0x8), region = 134 }
 0x326   :  { %467 = vsyncpa [#allocation10], 1 }
 0x327   :  { %469 = vsyncpa [#allocation10 + $0x1], 1 }

</bundles_post_ra>
